<compile_context>
chip_gen: v6e
topology: v6e:2x2x1
jax: 0.10.0
libtpu: 0.0.40
codegen_flags: <defaults>
</compile_context>

<pallas_src>
import functools

import jax
import jax.numpy as jnp
from jax.experimental import pallas as pl
from jax.experimental.pallas import tpu as pltpu

LEAKY_SLOPE = 0.01          # nn.LeakyReLU default
BN_EPS = 1e-5               # nn.BatchNorm1d default
ROW_TILE = 256              # rows per grid step (multiple of 8)
VMEM_LIMIT = 32 * 1024 * 1024   # explicit scoped-VMEM budget (safe on v5e/v6e/v7x)


# ----------------------------------------------------------------------------
# small math helpers (used inside kernels)
# ----------------------------------------------------------------------------
def _leaky(y):
    return jnp.where(y > 0, y, LEAKY_SLOPE * y)


def _elu(y):
    return jnp.where(y > 0, y, jnp.exp(jnp.minimum(y, 0.0)) - 1.0)


def _apply_act(y, act):
    if act == 'none':
        return y
    if act == 'leaky_relu':
        return _leaky(y)
    if act == 'sigmoid':
        return jax.nn.sigmoid(y)
    raise ValueError(f"unknown activation {act}")


# ----------------------------------------------------------------------------
# generic row-tiled pallas_call wrapper
# ----------------------------------------------------------------------------
def _round_up(x, m):
    return ((x + m - 1) // m) * m


def _row_call(kernel_fn, row_args, const_args, out_dims):
    """Run `kernel_fn(*row_refs, *const_refs, *out_refs)` over row tiles.

    row_args:  2-D arrays sharing the same row count R, tiled along rows.
    const_args: 2-D arrays passed whole (weights / biases / BN params).
    out_dims:  feature width of each (R, d) float32 output.
    """
    R = row_args[0].shape[0]
    tile = min(ROW_TILE, _round_up(max(R, 8), 8))
    Rp = _round_up(R, tile)
    row_args = [a.astype(jnp.float32) for a in row_args]
    if Rp != R:
        row_args = [jnp.pad(a, ((0, Rp - R), (0, 0))) for a in row_args]

    in_specs = ([pl.BlockSpec((tile, a.shape[1]), lambda i: (i, 0))
                 for a in row_args] +
                [pl.BlockSpec(c.shape, lambda i: (0, 0)) for c in const_args])
    out_specs = [pl.BlockSpec((tile, d), lambda i: (i, 0)) for d in out_dims]
    out_shape = [jax.ShapeDtypeStruct((Rp, d), jnp.float32) for d in out_dims]

    outs = pl.pallas_call(
        kernel_fn,
        grid=(Rp // tile,),
        in_specs=in_specs,
        out_specs=out_specs,
        out_shape=out_shape,
        compiler_params=pltpu.CompilerParams(
            dimension_semantics=("parallel",),
            vmem_limit_bytes=VMEM_LIMIT),
    )(*row_args, *const_args)
    return tuple(o[:R] for o in outs)


# ----------------------------------------------------------------------------
# Pallas kernels
# ----------------------------------------------------------------------------
def _ctx_node_kernel(x_ref, wn_ref, bn_ref, w1n_ref, wd_ref,
                     hv_ref, pre1_ref, sd_ref):
    """GetContext node side: project_node, node-half of project_edge1,
    dst-half of the attention logit (VPU row-reduce)."""
    x = x_ref[...].astype(jnp.bfloat16)
    hv = _leaky(jnp.dot(x, wn_ref[...], preferred_element_type=jnp.float32)
                + bn_ref[...])
    hv_ref[...] = hv
    pre1_ref[...] = jnp.dot(x, w1n_ref[...], preferred_element_type=jnp.float32)
    sd_ref[...] = jnp.sum(hv * wd_ref[...], axis=-1, keepdims=True)


def _ctx_edge_kernel(pre_ref, e_ref, w1e_ref, b1_ref, we_ref, wet_ref, bet_ref,
                     et_ref, se_ref):
    """GetContext edge side: he1 (never materialized to HBM), edge_transform(he1),
    edge-half of the attention logit."""
    e = e_ref[...].astype(jnp.bfloat16)
    he1 = _leaky(pre_ref[...]
                 + jnp.dot(e, w1e_ref[...], preferred_element_type=jnp.float32)
                 + b1_ref[...])
    se_ref[...] = jnp.sum(he1 * we_ref[...], axis=-1, keepdims=True)
    et_ref[...] = jnp.dot(he1.astype(jnp.bfloat16), wet_ref[...],
                          preferred_element_type=jnp.float32) + bet_ref[...]


def _gru_kernel(c_ref, h_ref,
                wir_ref, wiz_ref, win_ref, whr_ref, whz_ref, whn_ref,
                br_ref, bz_ref, bin_ref, bhn_ref, s_ref, t_ref,
                o_ref):
    """Fused: ELU(context) -> GRUCell (3 separate lane-aligned gate matmuls)
    -> ReLU -> BatchNorm scale/shift (identity for GetContext)."""
    x = _elu(c_ref[...])
    h = h_ref[...]
    xb = x.astype(jnp.bfloat16)
    hb = h.astype(jnp.bfloat16)
    r = jax.nn.sigmoid(
        jnp.dot(xb, wir_ref[...], preferred_element_type=jnp.float32)
        + jnp.dot(hb, whr_ref[...], preferred_element_type=jnp.float32)
        + br_ref[...])
    z = jax.nn.sigmoid(
        jnp.dot(xb, wiz_ref[...], preferred_element_type=jnp.float32)
        + jnp.dot(hb, whz_ref[...], preferred_element_type=jnp.float32)
        + bz_ref[...])
    n = jnp.tanh(
        jnp.dot(xb, win_ref[...], preferred_element_type=jnp.float32)
        + bin_ref[...]
        + r * (jnp.dot(hb, whn_ref[...], preferred_element_type=jnp.float32)
               + bhn_ref[...]))
    h_new = (1.0 - z) * n + z * h
    h_new = jnp.maximum(h_new, 0.0)                 # fused F.relu
    o_ref[...] = h_new * s_ref[...] + t_ref[...]    # fused BatchNorm


def _gnn_node_kernel(h_ref, wp_ref, bp_ref, wd_ref, ws_ref,
                     proj_ref, sd_ref, ss_ref):
    """GNN layer node side: project_node + both per-node logit halves."""
    h = h_ref[...]
    proj_ref[...] = (jnp.dot(h.astype(jnp.bfloat16), wp_ref[...],
                             preferred_element_type=jnp.float32) + bp_ref[...])
    sd_ref[...] = jnp.sum(h * wd_ref[...], axis=-1, keepdims=True)
    ss_ref[...] = jnp.sum(h * ws_ref[...], axis=-1, keepdims=True)


def _g3_kernel(m_ref, e3_ref, we_ref, b1_ref, w2_ref, b2_ref, w3_ref, b3_ref,
               s_ref, t_ref, rw_ref, rb_ref,
               bond_ref, wbond_ref):
    """Fused DTIConvGraph3Layer: (l1 with split weights) -> l2 -> l3 ->
    BatchNorm -> tanh readout weight -> weighted features."""
    h1 = _leaky(m_ref[...] + e3_ref[...] * we_ref[...] + b1_ref[...])
    h2 = _leaky(jnp.dot(h1.astype(jnp.bfloat16), w2_ref[...],
                        preferred_element_type=jnp.float32) + b2_ref[...])
    h3 = _leaky(jnp.dot(h2.astype(jnp.bfloat16), w3_ref[...],
                        preferred_element_type=jnp.float32) + b3_ref[...])
    bond = h3 * s_ref[...] + t_ref[...]
    w = jnp.tanh(jnp.sum(bond * rw_ref[...], axis=-1, keepdims=True)
                 + rb_ref[...])
    bond_ref[...] = bond
    wbond_ref[...] = w * bond


def _linear_bn_kernel(x_ref, w_ref, b_ref, s_ref, t_ref, o_ref, *, act):
    """Generic fused Linear + activation + BatchNorm scale/shift."""
    y = jnp.dot(x_ref[...].astype(jnp.bfloat16), w_ref[...],
                preferred_element_type=jnp.float32) + b_ref[...]
    y = _apply_act(y, act)
    o_ref[...] = y * s_ref[...] + t_ref[...]


# ----------------------------------------------------------------------------
# Parameter initialization (deterministic, PyTorch-default-like uniform bounds)
# ----------------------------------------------------------------------------
def _uniform(key, shape, bound):
    return jax.random.uniform(key, shape, jnp.float32, -bound, bound)


def _linear_init(key, in_dim, out_dim):
    k1, k2 = jax.random.split(key)
    bound = float(in_dim) ** -0.5
    return _uniform(k1, (in_dim, out_dim), bound), _uniform(k2, (out_dim,), bound)


def _gru_init(key, in_dim, hidden):
    k1, k2, k3, k4 = jax.random.split(key, 4)
    bound = float(hidden) ** -0.5
    w_ih = _uniform(k1, (in_dim, 3 * hidden), bound)
    w_hh = _uniform(k2, (hidden, 3 * hidden), bound)
    b_ih = _uniform(k3, (3 * hidden,), bound)
    b_hh = _uniform(k4, (3 * hidden,), bound)
    H = hidden
    return {'wir': w_ih[:, :H], 'wiz': w_ih[:, H:2 * H], 'win': w_ih[:, 2 * H:],
            'whr': w_hh[:, :H], 'whz': w_hh[:, H:2 * H], 'whn': w_hh[:, 2 * H:],
            'b_r': b_ih[:H] + b_hh[:H], 'b_z': b_ih[H:2 * H] + b_hh[H:2 * H],
            'b_in': b_ih[2 * H:], 'b_hn': b_hh[2 * H:]}


def _bn_init(dim):
    return {'gamma': jnp.ones((dim,), jnp.float32),
            'beta': jnp.zeros((dim,), jnp.float32),
            'mean': jnp.zeros((dim,), jnp.float32),
            'var': jnp.ones((dim,), jnp.float32)}


def _bn_scale_shift(bn):
    scale = bn['gamma'] * jax.lax.rsqrt(bn['var'] + BN_EPS)
    shift = bn['beta'] - bn['mean'] * scale
    return scale, shift


def init_params(key, node_feat_size, edge_feat_size, num_layers, graph_feat_size,
                outdim_g3, d_FC_layer, n_FC_layer, n_tasks):
    keys = iter(jax.random.split(key, 128))
    Gf = graph_feat_size
    p = {}
    # --- cov_graph: GetContext ---
    wn, bnn = _linear_init(next(keys), node_feat_size, Gf)
    w1, b1 = _linear_init(next(keys), node_feat_size + edge_feat_size, Gf)
    w2, b2 = _linear_init(next(keys), 2 * Gf, 1)
    wet, bet = _linear_init(next(keys), Gf, Gf)
    p['ctx'] = {'wn': wn, 'bn': bnn,
                'w1n': w1[:node_feat_size], 'w1e': w1[node_feat_size:], 'b1': b1,
                'w2_dst': w2[:Gf, 0], 'w2_e': w2[Gf:, 0], 'b2': b2[0],
                'wet': wet, 'bet': bet,
                'gru': _gru_init(next(keys), Gf, Gf)}
    # --- cov_graph: GNN layers ---
    p['gnn'] = []
    for _ in range(num_layers - 1):
        wpe, bpe = _linear_init(next(keys), 2 * Gf, 1)
        wp, bp = _linear_init(next(keys), Gf, Gf)
        p['gnn'].append({'w_pe_dst': wpe[:Gf, 0], 'w_pe_src': wpe[Gf:, 0],
                         'b_pe': bpe[0], 'wp': wp, 'bp': bp,
                         'gru': _gru_init(next(keys), Gf, Gf),
                         'bn': _bn_init(Gf)})
    # --- noncov_graph: DTIConvGraph3Layer (split l1 weight: row 0 = edge feat) ---
    D = outdim_g3
    w1g, b1g = _linear_init(next(keys), Gf + 1, D)
    w2g, b2g = _linear_init(next(keys), D, D)
    w3g, b3g = _linear_init(next(keys), D, D)
    p['g3'] = {'w1_e': w1g[0], 'w1_m': w1g[1:], 'b1': b1g,
               'w2': w2g, 'b2': b2g, 'w3': w3g, 'b3': b3g, 'bn': _bn_init(D)}
    # --- readout weighting ---
    wr, br = _linear_init(next(keys), D, 1)
    p['readout'] = {'w': wr[:, 0], 'b': br[0]}
    # --- FC head (mirrors the torch FC construction quirk exactly) ---
    fc = []
    d_graph = 2 * D
    for j in range(n_FC_layer):
        if j == 0:
            w, b = _linear_init(next(keys), d_graph, d_FC_layer)
            fc.append({'kind': 'linbn', 'w': w, 'b': b, 'bn': _bn_init(d_FC_layer)})
        if j == n_FC_layer - 1:
            w, b = _linear_init(next(keys), d_FC_layer, n_tasks)
            fc.append({'kind': 'lin', 'w': w, 'b': b})
        else:
            w, b = _linear_init(next(keys), d_FC_layer, d_FC_layer)
            fc.append({'kind': 'linbn', 'w': w, 'b': b, 'bn': _bn_init(d_FC_layer)})
    p['fc'] = fc
    return p


# ----------------------------------------------------------------------------
# XLA glue: segment softmax / reductions (data-dependent scatter)
# ----------------------------------------------------------------------------
def edge_softmax(logits, dst, num_nodes):
    """DGL edge_softmax: softmax of edge logits grouped by destination node."""
    lg = logits[:, 0]
    seg_max = jax.ops.segment_max(lg, dst, num_segments=num_nodes)
    seg_max = jnp.where(jnp.isfinite(seg_max), seg_max, 0.0)
    z = jnp.exp(lg - seg_max[dst])
    seg_sum = jax.ops.segment_sum(z, dst, num_segments=num_nodes)
    return (z / seg_sum[dst])[:, None]


def _gru_call(context, h, gru, scale, shift):
    H = h.shape[1]
    consts = [gru['wir'].astype(jnp.bfloat16), gru['wiz'].astype(jnp.bfloat16),
              gru['win'].astype(jnp.bfloat16),
              gru['whr'].astype(jnp.bfloat16), gru['whz'].astype(jnp.bfloat16),
              gru['whn'].astype(jnp.bfloat16),
              gru['b_r'].reshape(1, H), gru['b_z'].reshape(1, H),
              gru['b_in'].reshape(1, H), gru['b_hn'].reshape(1, H),
              scale.reshape(1, H), shift.reshape(1, H)]
    (h_new,) = _row_call(_gru_kernel, [context, h], consts, [H])
    return h_new


# ----------------------------------------------------------------------------
# Forward pass
# ----------------------------------------------------------------------------
def dti_forward(params, bg, bg3, node_feats, edge_feats, edge_feats3, mask):
    src, dst = bg['src'], bg['dst']
    V = node_feats.shape[0]
    c = params['ctx']
    Gf = c['wn'].shape[1]

    # ===== cov_graph: GetContext =====
    hv_new, pre1, sd = _row_call(
        _ctx_node_kernel, [node_feats],
        [c['wn'].astype(jnp.bfloat16), c['bn'].reshape(1, Gf),
         c['w1n'].astype(jnp.bfloat16), c['w2_dst'].reshape(1, Gf)],
        [Gf, Gf, 1])

    et, se = _row_call(
        _ctx_edge_kernel, [pre1[src], edge_feats],
        [c['w1e'].astype(jnp.bfloat16), c['b1'].reshape(1, Gf),
         c['w2_e'].reshape(1, Gf),
         c['wet'].astype(jnp.bfloat16), c['bet'].reshape(1, Gf)],
        [Gf, 1])

    logits = _leaky(sd[dst] + se + c['b2'])
    a = edge_softmax(logits, dst, V)
    context = jax.ops.segment_sum(a * et, dst, num_segments=V)
    h = _gru_call(context, hv_new, c['gru'],
                  jnp.ones((Gf,), jnp.float32), jnp.zeros((Gf,), jnp.float32))
    sum_node_feats = h

    # ===== cov_graph: GNN layers =====
    for gp in params['gnn']:
        hv_proj, sd_n, ss_n = _row_call(
            _gnn_node_kernel, [h],
            [gp['wp'].astype(jnp.bfloat16), gp['bp'].reshape(1, Gf),
             gp['w_pe_dst'].reshape(1, Gf), gp['w_pe_src'].reshape(1, Gf)],
            [Gf, 1, 1])
        logits = _leaky(sd_n[dst] + ss_n[src] + gp['b_pe'])
        a = edge_softmax(logits, dst, V)
        context = jax.ops.segment_sum(hv_proj[src] * a, dst, num_segments=V)
        scale, shift = _bn_scale_shift(gp['bn'])
        h = _gru_call(context, h, gp['gru'], scale, shift)
        sum_node_feats = sum_node_feats + h

    atom_feats = sum_node_feats * mask                        # (V, Gf)

    # ===== noncov_graph: DTIConvGraph3Layer + readout weighting (fused) =====
    g3 = params['g3']
    D = g3['w2'].shape[0]
    (atom_proj,) = _row_call(
        functools.partial(_linear_bn_kernel, act='none'), [atom_feats],
        [g3['w1_m'].astype(jnp.bfloat16), jnp.zeros((1, D), jnp.float32),
         jnp.ones((1, D), jnp.float32), jnp.zeros((1, D), jnp.float32)],
        [D])
    src3, dst3 = bg3['src'], bg3['dst']
    mproj = atom_proj[src3] + atom_proj[dst3]                 # (E3, D)
    scale3, shift3 = _bn_scale_shift(g3['bn'])
    ro = params['readout']
    bond, wbond = _row_call(
        _g3_kernel, [mproj, edge_feats3],
        [g3['w1_e'].reshape(1, D), g3['b1'].reshape(1, D),
         g3['w2'].astype(jnp.bfloat16), g3['b2'].reshape(1, D),
         g3['w3'].astype(jnp.bfloat16), g3['b3'].reshape(1, D),
         scale3.reshape(1, D), shift3.reshape(1, D),
         ro['w'].reshape(1, D), jnp.reshape(ro['b'], (1, 1))],
        [D, D])

    # ===== readout: EdgeWeightedSumAndMax via segment reductions =====
    eg, G = bg3['edge_graph'], bg3['num_graphs']
    h_sum = jax.ops.segment_sum(wbond, eg, num_segments=G)
    h_max = jax.ops.segment_max(bond, eg, num_segments=G)
    h_max = jnp.where(jnp.isfinite(h_max), h_max, 0.0)        # guard empty graphs
    h_g = jnp.concatenate([h_sum, h_max], axis=1)             # (G, 2*D)

    # ===== FC head + sigmoid =====
    out = h_g
    for layer in params['fc']:
        nout = layer['w'].shape[1]
        if layer['kind'] == 'linbn':
            s, t = _bn_scale_shift(layer['bn'])
            (out,) = _row_call(
                functools.partial(_linear_bn_kernel, act='leaky_relu'), [out],
                [layer['w'].astype(jnp.bfloat16), layer['b'].reshape(1, nout),
                 s.reshape(1, nout), t.reshape(1, nout)],
                [nout])
        else:                                                 # final Linear + sigmoid
            (out,) = _row_call(
                functools.partial(_linear_bn_kernel, act='sigmoid'), [out],
                [layer['w'].astype(jnp.bfloat16), layer['b'].reshape(1, nout),
                 jnp.ones((1, nout), jnp.float32), jnp.zeros((1, nout), jnp.float32)],
                [nout])
    return out


# ----------------------------------------------------------------------------
# Example run
# ----------------------------------------------------------------------------
if __name__ == "__main__":
    key = jax.random.PRNGKey(0)

    node_feat_size, edge_feat_size = 8, 6
    num_layers, graph_feat_size = 2, 32
    outdim_g3, d_FC_layer, n_FC_layer, n_tasks = 32, 32, 2, 1

    num_graphs = 2
    nodes_per_graph = 5
    V = num_graphs * nodes_per_graph

    # covalent (ligand) graph bg: bidirectional chain inside each graph
    src_list, dst_list = [], []
    for g in range(num_graphs):
        base = g * nodes_per_graph
        for i in range(nodes_per_graph - 1):
            src_list += [base + i, base + i + 1]
            dst_list += [base + i + 1, base + i]
    src = jnp.array(src_list, dtype=jnp.int32)
    dst = jnp.array(dst_list, dtype=jnp.int32)
    E = int(src.shape[0])

    # interaction graph bg3: all (i < j) pairs inside each graph
    src3_list, dst3_list, eg_list = [], [], []
    for g in range(num_graphs):
        base = g * nodes_per_graph
        for i in range(nodes_per_graph):
            for j in range(i + 1, nodes_per_graph):
                src3_list.append(base + i)
                dst3_list.append(base + j)
                eg_list.append(g)
    src3 = jnp.array(src3_list, dtype=jnp.int32)
    dst3 = jnp.array(dst3_list, dtype=jnp.int32)
    edge_graph = jnp.array(eg_list, dtype=jnp.int32)
    E3 = int(src3.shape[0])

    k1, k2, k3, k4, k5 = jax.random.split(key, 5)
    node_feats = jax.random.normal(k1, (V, node_feat_size), jnp.float32)
    edge_feats = jax.random.normal(k2, (E, edge_feat_size), jnp.float32)
    edge_feats3 = jax.random.normal(k3, (E3, 1), jnp.float32)
    mask = (jax.random.uniform(k4, (V, 1)) > 0.3).astype(jnp.float32)

    params = init_params(k5, node_feat_size, edge_feat_size, num_layers,
                         graph_feat_size, outdim_g3, d_FC_layer, n_FC_layer,
                         n_tasks)

    bg = {'src': src, 'dst': dst}
    bg3 = {'src': src3, 'dst': dst3, 'edge_graph': edge_graph,
           'num_graphs': num_graphs}

    out = dti_forward(params, bg, bg3, node_feats, edge_feats, edge_feats3, mask)
    out = jax.block_until_ready(out)

    assert out.shape == (num_graphs, n_tasks), out.shape
    assert bool(jnp.all(jnp.isfinite(out)))
    assert bool(jnp.all((out >= 0.0) & (out <= 1.0)))
    print("KERNEL_OK")
</pallas_src>

<mosaic_0001>
module attributes {stable_mosaic.version = 11 : i64} {
  func.func @_ctx_node_kernel(%arg0: i32, %arg1: memref<16x8xf32, #tpu.memory_space<vmem>>, %arg2: memref<8x32xbf16, #tpu.memory_space<vmem>>, %arg3: memref<1x32xf32, #tpu.memory_space<vmem>>, %arg4: memref<8x32xbf16, #tpu.memory_space<vmem>>, %arg5: memref<1x32xf32, #tpu.memory_space<vmem>>, %arg6: memref<16x32xf32, #tpu.memory_space<vmem>>, %arg7: memref<16x32xf32, #tpu.memory_space<vmem>>, %arg8: memref<16x1xf32, #tpu.memory_space<vmem>>) attributes {dimension_semantics = [#tpu.dimension_semantics<parallel>], iteration_bounds = array<i64: 1>, scalar_prefetch = 0 : i64, scratch_operands = 0 : i64, tpu.core_type = #tpu.core_type<tc>, window_params = [{transform_indices = @transform_0, window_bounds = array<i64: 16, 8>}, {pipeline_mode = #tpu.pipeline_mode<synchronous>, transform_indices = @transform_1, window_bounds = array<i64: 8, 32>}, {pipeline_mode = #tpu.pipeline_mode<synchronous>, transform_indices = @transform_2, window_bounds = array<i64: 1, 32>}, {pipeline_mode = #tpu.pipeline_mode<synchronous>, transform_indices = @transform_3, window_bounds = array<i64: 8, 32>}, {pipeline_mode = #tpu.pipeline_mode<synchronous>, transform_indices = @transform_4, window_bounds = array<i64: 1, 32>}, {transform_indices = @transform_5, window_bounds = array<i64: 16, 32>}, {transform_indices = @transform_6, window_bounds = array<i64: 16, 32>}, {transform_indices = @transform_7, window_bounds = array<i64: 16, 1>}]} {
    %c0 = arith.constant 0 : index
    %c0_0 = arith.constant 0 : index
    %0 = vector.load %arg1[%c0, %c0_0] : memref<16x8xf32, #tpu.memory_space<vmem>>, vector<16x8xf32>
    %1 = arith.truncf %0 : vector<16x8xf32> to vector<16x8xbf16>
    %c0_1 = arith.constant 0 : index
    %c0_2 = arith.constant 0 : index
    %2 = vector.load %arg2[%c0_1, %c0_2] : memref<8x32xbf16, #tpu.memory_space<vmem>>, vector<8x32xbf16>
    %cst = arith.constant dense<0.000000e+00> : vector<16x32xf32>
    %3 = tpu.matmul %1, %2, %cst {dimension_numbers = #tpu.dot_dimension_numbers<[1], [0], [0], [1], [0, 0, 1, 1], [], []>} : vector<16x8xbf16>, vector<8x32xbf16>, vector<16x32xf32> -> vector<16x32xf32>
    %c0_3 = arith.constant 0 : index
    %c0_4 = arith.constant 0 : index
    %4 = vector.load %arg3[%c0_3, %c0_4] : memref<1x32xf32, #tpu.memory_space<vmem>>, vector<1x32xf32>
    %5 = vector.broadcast %4 : vector<1x32xf32> to vector<16x32xf32>
    %6 = arith.addf %3, %5 : vector<16x32xf32>
    %cst_5 = arith.constant 0.000000e+00 : f32
    %7 = vector.broadcast %cst_5 : f32 to vector<16x32xf32>
    %8 = arith.cmpf ogt, %6, %7 : vector<16x32xf32>
    %cst_6 = arith.constant 0.00999999977 : f32
    %9 = vector.broadcast %cst_6 : f32 to vector<16x32xf32>
    %10 = arith.mulf %9, %6 : vector<16x32xf32>
    %11 = arith.select %8, %6, %10 : vector<16x32xi1>, vector<16x32xf32>
    %c0_7 = arith.constant 0 : index
    %c0_8 = arith.constant 0 : index
    %12 = vector.load %arg6[%c0_7, %c0_8] : memref<16x32xf32, #tpu.memory_space<vmem>>, vector<16x32xf32>
    tpu.vector_store %arg6[%c0_7, %c0_8], %11 {strides = array<i32>} : memref<16x32xf32, #tpu.memory_space<vmem>>, vector<16x32xf32>,
    %c0_9 = arith.constant 0 : index
    %c0_10 = arith.constant 0 : index
    %13 = vector.load %arg4[%c0_9, %c0_10] : memref<8x32xbf16, #tpu.memory_space<vmem>>, vector<8x32xbf16>
    %cst_11 = arith.constant dense<0.000000e+00> : vector<16x32xf32>
    %14 = tpu.matmul %1, %13, %cst_11 {dimension_numbers = #tpu.dot_dimension_numbers<[1], [0], [0], [1], [0, 0, 1, 1], [], []>} : vector<16x8xbf16>, vector<8x32xbf16>, vector<16x32xf32> -> vector<16x32xf32>
    %c0_12 = arith.constant 0 : index
    %c0_13 = arith.constant 0 : index
    %15 = vector.load %arg7[%c0_12, %c0_13] : memref<16x32xf32, #tpu.memory_space<vmem>>, vector<16x32xf32>
    tpu.vector_store %arg7[%c0_12, %c0_13], %14 {strides = array<i32>} : memref<16x32xf32, #tpu.memory_space<vmem>>, vector<16x32xf32>,
    %c0_14 = arith.constant 0 : index
    %c0_15 = arith.constant 0 : index
    %16 = vector.load %arg5[%c0_14, %c0_15] : memref<1x32xf32, #tpu.memory_space<vmem>>, vector<1x32xf32>
    %17 = vector.broadcast %16 : vector<1x32xf32> to vector<16x32xf32>
    %18 = arith.mulf %11, %17 : vector<16x32xf32>
    %cst_16 = arith.constant dense<0.000000e+00> : vector<16xf32>
    %19 = vector.multi_reduction <add>, %18, %cst_16 [1] : vector<16x32xf32> to vector<16xf32>
    %20 = vector.shape_cast %19 : vector<16xf32> to vector<16x1xf32>
    %c0_17 = arith.constant 0 : index
    %c0_18 = arith.constant 0 : index
    %21 = vector.load %arg8[%c0_17, %c0_18] : memref<16x1xf32, #tpu.memory_space<vmem>>, vector<16x1xf32>
    tpu.vector_store %arg8[%c0_17, %c0_18], %20 {strides = array<i32>} : memref<16x1xf32, #tpu.memory_space<vmem>>, vector<16x1xf32>,
    return
  }
  func.func @transform_0(%arg0: i32) -> (i32, i32) {
    %c0_i32 = arith.constant 0 : i32
    %c0_i32_0 = arith.constant 0 : i32
    return %arg0, %c0_i32 : i32, i32
  }
  func.func @transform_1(%arg0: i32) -> (i32, i32) {
    %c0_i32 = arith.constant 0 : i32
    %c0_i32_0 = arith.constant 0 : i32
    %c0_i32_1 = arith.constant 0 : i32
    return %c0_i32, %c0_i32_0 : i32, i32
  }
  func.func @transform_2(%arg0: i32) -> (i32, i32) {
    %c0_i32 = arith.constant 0 : i32
    %c0_i32_0 = arith.constant 0 : i32
    %c0_i32_1 = arith.constant 0 : i32
    return %c0_i32, %c0_i32_0 : i32, i32
  }
  func.func @transform_3(%arg0: i32) -> (i32, i32) {
    %c0_i32 = arith.constant 0 : i32
    %c0_i32_0 = arith.constant 0 : i32
    %c0_i32_1 = arith.constant 0 : i32
    return %c0_i32, %c0_i32_0 : i32, i32
  }
  func.func @transform_4(%arg0: i32) -> (i32, i32) {
    %c0_i32 = arith.constant 0 : i32
    %c0_i32_0 = arith.constant 0 : i32
    %c0_i32_1 = arith.constant 0 : i32
    return %c0_i32, %c0_i32_0 : i32, i32
  }
  func.func @transform_5(%arg0: i32) -> (i32, i32) {
    %c0_i32 = arith.constant 0 : i32
    %c0_i32_0 = arith.constant 0 : i32
    return %arg0, %c0_i32 : i32, i32
  }
  func.func @transform_6(%arg0: i32) -> (i32, i32) {
    %c0_i32 = arith.constant 0 : i32
    %c0_i32_0 = arith.constant 0 : i32
    return %arg0, %c0_i32 : i32, i32
  }
  func.func @transform_7(%arg0: i32) -> (i32, i32) {
    %c0_i32 = arith.constant 0 : i32
    %c0_i32_0 = arith.constant 0 : i32
    return %arg0, %c0_i32 : i32, i32
  }
}

</mosaic_0001>

<bundles_post_ra>
// kernel: tpu_custom_call.1
= control target key start
LH: loop header
LB: loop body
LE: loop exit
PB: predicated region body
PF: predicated region fallthrough
CT: control target
= control target key end

     0   :  { %13 = vsyncpa [#allocation3], 0  ;;  %vm41_vm0 = vcmask 1043456   ;;  %v266_v2 = vmov 0.0   ;;  %vm267_vm1 = vmmov 0   ;;  %vm37_vm2 = vcmask 64512   ;;  %s348_s0 = inlined_call_operand.vmem [shape: f32[16,8], index: 0, kind: input, shape index: {}]   ;;  %s349_s1 = inlined_call_operand.vmem [shape: bf16[8,32], index: 1, kind: input, shape index: {}]   ;;  %s350_s2 = inlined_call_operand.vmem [shape: f32[1,32], index: 2, kind: input, shape index: {}]   ;;  %s351_s3 = inlined_call_operand.vmem [shape: bf16[8,32], index: 3, kind: input, shape index: {}]   ;;  %s352_s4 = inlined_call_operand.vmem [shape: f32[1,32], index: 4, kind: input, shape index: {}]   ;;  %s353_s5 = inlined_call_operand.hbm [shape: f32[16,32], index: 5, kind: output, shape index: {0}]   ;;  %s354_s6 = inlined_call_operand.hbm [shape: f32[16,32], index: 6, kind: output, shape index: {1}]   ;;  %s355_s7 = inlined_call_operand.vmem [shape: f32[16,1], index: 7, kind: output, shape index: {2}]  }
   0x1   :  { %v29_v0 = vld [vmem:[%s349_s1] sm:$0xf]  ;;  %204 = vmatprep.subr.bf16.mxu0 %v266_v2  ;;  %206 = vmatprep.mubr.msk.bf16.mxu0 %vm267_vm1, %v266_v2  ;;  %v27_v4 = vld [vmem:[%s348_s0 + $0x8] sm:$0xff] }
   0x2   :  { %v26_v1 = vld [vmem:[%s348_s0] sm:$0xff]  ;;  %v43_v3 = vsel %vm41_vm0, %v29_v0, 0  ;;  %210 = vmatprep.subr.bf16.mxu1 %v266_v2 }
   0x3   :  { %v95_v5 = vld [vmem:[%s351_s3] sm:$0xf]  ;;  %205 = vmatpush3.bf16.msra.mxu0 %v43_v3  ;;  %v28_v6 = vpack.c.bf16 %v27_v4, %v26_v1 }
   0x4   :  { %v97_v7 = vsel %vm41_vm0, %v95_v5, 0 }
   0x5   :  { %14 = vsyncpa [#allocation5], 0  ;;  %211 = vmatpush3.bf16.msra.mxu1 %v97_v7  ;;  %212 = vmatprep.mubr.msk.bf16.mxu1 %vm267_vm1, %v266_v2  ;;  %v196_v8 = vld [vmem:[%s350_s2] ss:$0 sm:$0xff]  ;;  %vm92_vm3 = vcmask 261120   ;;  %s268_s2 = smov [#allocation2]  }
   0x6   :  { %207 = vmatmul.mubr.msk.bf16.vlgmr.msra.gmra.mxu0 %vm37_vm2, %v28_v6  ;;  %v199_v14 = vld [vmem:[%s352_s4] ss:$0 sm:$0xff]  ;;  %s165_s4 = sshll.u32 %s268_s2, 4  ;;  %s269_s10 = smov [#allocation4]   ;;  %s166_s4 = int_to_ptr.vmem [resolvable:$true] %s165_s4 }
   0x7   :  { %s177_s11 = sshll.u32 %s269_s10, 4  ;;  %s222_s12 = scalar_lea.vmem %s166_s4, 256  ;;  %s178_s11 = int_to_ptr.vmem [resolvable:$true] %s177_s11 }
   0x8   :  { %213 = vmatmul.mubr.msk.bf16.vlgmr.msra.gmra.mxu1 %vm37_vm2, %v28_v6  ;;  %p223_p0 = scmp.ne.s32.totalorder %s166_s4, %s222_s12  ;;  %p227_p1 = scmp.lt.s32.totalorder %s166_s4, %s166_s4 }
   0x9   :  { %p228_p2 = scmp.lt.s32.totalorder %s222_s12, %s222_s12 }
   0xb   :  { %p229_p3 = por %p228_p2, %p227_p1 }
   0xd   :  { %p230_p4 = pnand %p229_p3, %p223_p0 }
  0xc6   :  { %v79_v9 = vpop.f32.mrf.mxu0 }
  0xc7   :  { %v80_v10 = vadd.f32 %v196_v8, %v79_v9 }
  0xc8   :  { %v133_v11 = vpop.f32.mrf.mxu1  ;;  %v208_v12 = vpop.f32.mrf.mxu0 }
  0xc9   :  { %140 = vst.msk [vmem:[#allocation4] sm:$0xff] %vm92_vm3, %v133_v11  ;;  %v88_v13 = vmul.f32 0.01, %v80_v10  ;;  %vm86_vm4 = vcmp.gt.f32.partialorder %v80_v10, 0.0 }
  0xca   :  { %v214_v15 = vpop.f32.mrf.mxu1  ;;  %v82_v16 = vpop.f32.mrf.mxu0 }
  0xcb   :  { %v83_v17 = vadd.f32 %v196_v8, %v82_v16  ;;  %v90_v18 = vsel %vm86_vm4, %v80_v10, %v88_v13 }
  0xcc   :  { %v136_v19 = vpop.f32.mrf.mxu1  ;;  %v209_v20 = vpop.f32.mrf.mxu0  ;;  %v149_v21 = vmul.f32 %v199_v14, %v90_v18  ;;  %93 = vst.msk [vmem:[#allocation2] sm:$0xff] %vm92_vm3, %v90_v18 }
  0xcd   :  { %141 = vst.msk [vmem:[#allocation4 + $0x8] sm:$0xff] %vm92_vm3, %v136_v19  ;;  %vm87_vm5 = vcmp.gt.f32.partialorder %v83_v17, 0.0  ;;  %v89_v22 = vmul.f32 0.01, %v83_v17 }
  0xce   :  { %v215_v23 = vpop.f32.mrf.mxu1  ;;  %v151_v24 = vsel %vm92_vm3, %v149_v21, 0.0 }
  0xcf   :  { %152 = vadd.xlane.f32.xlu0 %v151_v24  ;;  %v91_v25 = vsel %vm87_vm5, %v83_v17, %v89_v22 }
  0xd0   :  { %v150_v26 = vmul.f32 %v199_v14, %v91_v25  ;;  %94 = vst.msk [vmem:[#allocation2 + $0x8] sm:$0xff] %vm92_vm3, %v91_v25 }
  0xd2   :  { %v154_v27 = vsel %vm92_vm3, %v150_v26, 0.0 }
  0xd3   :  { %155 = vadd.xlane.f32.xlu0 %v154_v27 }
  0xd4   :  { %233 = shalt.err (!%p230_p4)
}
  0xd5   :  { %s270_s13 = smov 128   ;;  %s271_s14 = smov 8  }
  0xd6   :  { %171 = dma.vmem_to_hbm [thread:$0]  %s166_s4, 256, %s353_s5, [#allocation3], %s270_s13, %s270_s13, %s271_s14  }
  0xd7   :  { %s242_s17 = scalar_lea.vmem %s178_s11, 256  ;;  %p247_p6 = scmp.lt.s32.totalorder %s178_s11, %s178_s11 }
  0xd8   :  { %p243_p5 = scmp.ne.s32.totalorder %s178_s11, %s242_s17  ;;  %p248_p7 = scmp.lt.s32.totalorder %s242_s17, %s242_s17 }
  0xda   :  { %p249_p8 = por %p248_p7, %p247_p6 }
  0xdc   :  { %p250_p9 = pnand %p249_p8, %p243_p5 }
  0xde   :  { %253 = shalt.err (!%p250_p9)
}
  0xdf   :  { %183 = dma.vmem_to_hbm [thread:$0]  %s178_s11, 256, %s354_s6, [#allocation5], %s270_s13, %s270_s13, %s271_s14   ;;  %vm157_vm6 = vcmask 7168  }
 0x158   :  { %v153_v28 = vpop.xlane.xlu0 %152 }
 0x159   :  { %158 = vst.msk [vmem:[%s355_s7] sm:$0xff] %vm157_vm6, %v153_v28 }
 0x15c   :  { %v156_v29 = vpop.xlane.xlu0 %155 }
 0x15d   :  { %159 = vst.msk [vmem:[%s355_s7 + $0x8] sm:$0xff] %vm157_vm6, %v156_v29 }
 0x15e   :  { %262 = dma.done.wait [#allocation3], 256  }
 0x15f   :  { %263 = vsyncadd [#allocation3], 4294967040 }
 0x160   :  { %264 = dma.done.wait [#allocation5], 256  }
 0x161   :  { %265 = vsyncadd [#allocation5], 4294967040 }
 0x162   :  { %194 = vsyncpa [#allocation3], 1 }
 0x163   :  { %195 = vsyncpa [#allocation5], 1 }

</bundles_post_ra>
